<compile_context>
chip_gen: v6e
topology: v6e:2x2x1
jax: 0.10.0
libtpu: 0.0.40
codegen_flags: <defaults>
</compile_context>

<pallas_src>
import jax
import jax.numpy as jnp
from jax.experimental import pallas as pl
from jax.experimental.pallas import tpu as pltpu


# ---------------------------------------------------------------------------
# One-time probe: does pltpu.roll follow jnp.roll's rotation direction?
# ---------------------------------------------------------------------------
def detect_roll_is_jnp():
    def k(x_ref, o_ref):
        o_ref[...] = pltpu.roll(x_ref[...], 1, 1)

    x = jnp.tile(jnp.arange(128, dtype=jnp.float32)[None, :], (8, 1))
    y = pl.pallas_call(k, out_shape=jax.ShapeDtypeStruct((8, 128), jnp.float32))(x)
    # jnp.roll(x, 1) puts x[..., -1]=127 at lane 0; the other convention puts 1 there.
    return bool(y[0, 0] == 127.0)


# ---------------------------------------------------------------------------
# Fused Pallas kernel: all LSTM layers (both directions) + final Linear
# ---------------------------------------------------------------------------
def make_fused_kernel(T, BP, H, num_layers, roll_is_jnp):
    G = 4 * H          # per-direction gate width, lanes ordered [i | f | g | o]
    R = 2 * BP         # packed rows: forward batch block | backward batch block
    NL = num_layers

    def rot_to_front(v, k):
        # result[..., i] = v[..., (i + k) % W]  (bring lane-group k to group 0)
        w = v.shape[-1]
        s = (w - k) % w if roll_is_jnp else k % w
        return pltpu.roll(v, s, v.ndim - 1) if s else v

    def rot_from_front(v, k):
        # result[..., i + k] = v[..., i]        (push lane-group 0 to group k)
        w = v.shape[-1]
        s = k % w if roll_is_jnp else (w - k) % w
        return pltpu.roll(v, s, v.ndim - 1) if s else v

    def kernel(*refs):
        x_ref = refs[0]
        layer_refs = refs[1:1 + 3 * NL]
        fc_w_ref = refs[1 + 3 * NL]
        fc_b_ref = refs[2 + 3 * NL]
        out_ref = refs[3 + 3 * NL]
        yf_scr, yb_scr, gxf_scr, gxb_scr = refs[4 + 3 * NL:]

        # Loop-invariant masks (built once; reused across all layers/steps).
        lane_grp = jax.lax.broadcasted_iota(jnp.int32, (R, G), 1) // H
        row_id = jax.lax.broadcasted_iota(jnp.int32, (R, G), 0)
        is_g_gate = lane_grp == 2                       # tanh gate
        mask_f = (row_id < BP) & (lane_grp == 0)        # keep h_f at group 0
        mask_b = (row_id >= BP) & (lane_grp == 1)       # keep h_b at group 1
        zeros_rg = jnp.zeros((R, G), jnp.float32)

        for l in range(NL):
            w_in, b_in, whh = layer_refs[3 * l: 3 * l + 3]

            # ---- hoisted input projection: one (T*BP,K)x(K,8H) MXU matmul ----
            if l == 0:
                xin = x_ref[...]                               # (T*BP, D0_pad)
            else:
                # previous layer's outputs: [y_f | y_b | 0 | 0] per row
                xin = yf_scr[...] + yb_scr[...]                # (T*BP, 4H)
            gfb = jnp.dot(xin, w_in[...],
                          preferred_element_type=jnp.float32) + b_in[...]
            gxf_scr[...] = gfb[:, 0:G]                         # fwd gates, time t
            gxb_scr[...] = gfb[:, G:2 * G]                     # bwd gates, time t

            whh_v = whh[...]                                   # (4H, 4H) block packed

            # ---- serial recurrence: both directions per step ------------------
            h_state = zeros_rg                                 # [h_f|0|0|0 ; 0|h_b|0|0]
            c_state = zeros_rg                                 # real c lives at group 0
            for t in range(T):                                 # static unroll (T small)
                tb = T - 1 - t
                g_rec = jnp.dot(h_state, whh_v,
                                preferred_element_type=jnp.float32)      # (R, 4H)
                gx = jnp.concatenate(                                     # vreg-aligned
                    [gxf_scr[t * BP:(t + 1) * BP, :],
                     gxb_scr[tb * BP:(tb + 1) * BP, :]], axis=0)
                g = g_rec + gx

                # full-tile nonlinearities: 1 sigmoid + 1 tanh + 1 select
                act = jnp.where(is_g_gate, jnp.tanh(g), jax.nn.sigmoid(g))

                f0 = rot_to_front(act, H)        # f aligned to group 0
                g0 = rot_to_front(act, 2 * H)    # g aligned to group 0
                o0 = rot_to_front(act, 3 * H)    # o aligned to group 0

                c_state = f0 * c_state + act * g0        # valid at group 0
                h0 = o0 * jnp.tanh(c_state)              # valid at group 0
                h1 = rot_from_front(h0, H)               # valid at group 1

                h_state = (jnp.where(mask_f, h0, zeros_rg)
                           + jnp.where(mask_b, h1, zeros_rg))

                # full unmasked (8,128) stores, 8-row aligned static offsets
                yf_scr[t * BP:(t + 1) * BP, :] = h_state[0:BP, :]
                yb_scr[tb * BP:(tb + 1) * BP, :] = h_state[BP:R, :]

        # ---- final Linear fused; lane-dense padded output -----------------------
        y = yf_scr[...] + yb_scr[...]                          # [y_f | y_b | 0 | 0]
        out_ref[...] = (jnp.dot(y, fc_w_ref[...],
                                preferred_element_type=jnp.float32) + fc_b_ref[...])

    return kernel


# ---------------------------------------------------------------------------
# Forward pass (matches RNN.forward at eval time)
# ---------------------------------------------------------------------------
def rnn_forward(emb_idx, case_features, params, kparams, *,
                input_rep, num_layers, hidden_dim, output_dim, roll_is_jnp):
    T, B = emb_idx.shape
    H = hidden_dim
    G = 4 * H
    BP = 8 * pl.cdiv(B, 8)                                   # batch padded to sublanes

    # frozen embedding lookup + dropout(identity) + case-feature concat (JAX glue)
    x = params["embedding"][emb_idx]                         # (T, B, E)
    if input_rep == 1:
        x = jnp.concatenate([x, case_features], axis=2)      # (T, B, E + 3)
    D0 = x.shape[-1]
    D0p = kparams["d0_pad"]

    # pad batch -> BP sublanes and features -> D0p lanes (zero rows/cols)
    xp = jnp.zeros((T, BP, D0p), jnp.float32)
    xp = xp.at[:, :B, :D0].set(x.astype(jnp.float32))
    x2d = xp.reshape(T * BP, D0p)                            # row = t*BP + b

    args = [x2d]
    for l in range(num_layers):
        args += [kparams[f"w_in_l{l}"], kparams[f"b_in_l{l}"], kparams[f"whh_l{l}"]]
    args += [kparams["fc_w_pad"], kparams["fc_b_pad"]]
    out_pad = kparams["fc_w_pad"].shape[1]

    out = pl.pallas_call(
        make_fused_kernel(T, BP, H, num_layers, roll_is_jnp),
        out_shape=jax.ShapeDtypeStruct((T * BP, out_pad), jnp.float32),
        scratch_shapes=[
            pltpu.VMEM((T * BP, G), jnp.float32),   # y forward  ([h_f|0|0|0] rows)
            pltpu.VMEM((T * BP, G), jnp.float32),   # y backward ([0|h_b|0|0] rows)
            pltpu.VMEM((T * BP, G), jnp.float32),   # hoisted fwd input projections
            pltpu.VMEM((T * BP, G), jnp.float32),   # hoisted bwd input projections
        ],
    )(*args)

    return out.reshape(T, BP, out_pad)[:, :B, :output_dim]


# ---------------------------------------------------------------------------
# Pure-JAX reference (lax.scan LSTM) used only to verify the kernel
# ---------------------------------------------------------------------------
def _lstm_dir_ref(x, w_ih, w_hh, b, H):
    def step(carry, x_t):
        h, c = carry
        gates = x_t @ w_ih.T + h @ w_hh.T + b[0]
        i, f, g, o = jnp.split(gates, 4, axis=-1)
        i, f, o = jax.nn.sigmoid(i), jax.nn.sigmoid(f), jax.nn.sigmoid(o)
        g = jnp.tanh(g)
        c = f * c + i * g
        h = o * jnp.tanh(c)
        return (h, c), h
    B = x.shape[1]
    init = (jnp.zeros((B, H), jnp.float32), jnp.zeros((B, H), jnp.float32))
    _, ys = jax.lax.scan(step, init, x)
    return ys


def rnn_forward_ref(emb_idx, case_features, params, *, input_rep, num_layers, hidden_dim):
    x = params["embedding"][emb_idx]
    if input_rep == 1:
        x = jnp.concatenate([x, case_features], axis=2)
    for l in range(num_layers):
        y_fwd = _lstm_dir_ref(x, params[f"w_ih_l{l}"], params[f"w_hh_l{l}"],
                              params[f"b_l{l}"], hidden_dim)
        y_bwd = _lstm_dir_ref(x[::-1], params[f"w_ih_l{l}_rev"], params[f"w_hh_l{l}_rev"],
                              params[f"b_l{l}_rev"], hidden_dim)[::-1]
        x = jnp.concatenate([y_fwd, y_bwd], axis=2)
    T, B, _ = x.shape
    out = x.reshape(T * B, 2 * hidden_dim) @ params["fc_w_t"] + params["fc_b"]
    return out.reshape(T, B, -1)


# ---------------------------------------------------------------------------
# Deterministic parameter init (shapes follow the nn.Module __init__)
# ---------------------------------------------------------------------------
def init_params(key, *, vocab, embedding_dim, input_rep, num_layers, hidden_dim, output_dim):
    params = {}
    k_emb, key = jax.random.split(key)
    params["embedding"] = jax.random.normal(k_emb, (vocab, embedding_dim), jnp.float32)

    bound = 1.0 / jnp.sqrt(hidden_dim)
    in_dim0 = embedding_dim + 3 * input_rep
    for l in range(num_layers):
        d_in = in_dim0 if l == 0 else 2 * hidden_dim
        for suffix in ("", "_rev"):
            k1, k2, k3, k4, key = jax.random.split(key, 5)
            params[f"w_ih_l{l}{suffix}"] = jax.random.uniform(
                k1, (4 * hidden_dim, d_in), jnp.float32, -bound, bound)
            params[f"w_hh_l{l}{suffix}"] = jax.random.uniform(
                k2, (4 * hidden_dim, hidden_dim), jnp.float32, -bound, bound)
            b_ih = jax.random.uniform(k3, (4 * hidden_dim,), jnp.float32, -bound, bound)
            b_hh = jax.random.uniform(k4, (4 * hidden_dim,), jnp.float32, -bound, bound)
            params[f"b_l{l}{suffix}"] = (b_ih + b_hh).reshape(1, 4 * hidden_dim)

    kf1, kf2, key = jax.random.split(key, 3)
    fc_bound = 1.0 / jnp.sqrt(2 * hidden_dim)
    fc_w = jax.random.uniform(kf1, (output_dim, 2 * hidden_dim), jnp.float32, -fc_bound, fc_bound)
    params["fc_w_t"] = fc_w.T                                 # (2H, output_dim)
    params["fc_b"] = jax.random.uniform(kf2, (output_dim,), jnp.float32, -fc_bound, fc_bound)
    return params


def pack_params(params, *, num_layers, hidden_dim, output_dim, embedding_dim, input_rep):
    """Pre-transpose / zero-pad / pack weights into the kernel layout (done once)."""
    H = hidden_dim
    G = 4 * H
    kp = {}
    d0 = embedding_dim + 3 * input_rep
    d0_pad = 128 * pl.cdiv(d0, 128)                           # lane-dense K for layer 0
    kp["d0_pad"] = d0_pad

    for l in range(num_layers):
        d_in = d0 if l == 0 else 2 * H
        k_pad = d0_pad if l == 0 else G
        w_f = jnp.zeros((k_pad, G), jnp.float32).at[:d_in, :].set(params[f"w_ih_l{l}"].T)
        w_b = jnp.zeros((k_pad, G), jnp.float32).at[:d_in, :].set(params[f"w_ih_l{l}_rev"].T)
        kp[f"w_in_l{l}"] = jnp.concatenate([w_f, w_b], axis=1)           # (K, 8H)
        kp[f"b_in_l{l}"] = jnp.concatenate(
            [params[f"b_l{l}"], params[f"b_l{l}_rev"]], axis=1)          # (1, 8H)
        whh = jnp.zeros((G, G), jnp.float32)
        whh = whh.at[0:H, :].set(params[f"w_hh_l{l}"].T)                 # fwd rows
        whh = whh.at[H:2 * H, :].set(params[f"w_hh_l{l}_rev"].T)         # bwd rows
        kp[f"whh_l{l}"] = whh                                            # (4H, 4H)

    out_pad = 128 * pl.cdiv(output_dim, 128)                             # lane-dense out
    fc_w = jnp.zeros((G, out_pad), jnp.float32).at[0:2 * H, :output_dim].set(params["fc_w_t"])
    fc_b = jnp.zeros((1, out_pad), jnp.float32).at[0, :output_dim].set(params["fc_b"])
    kp["fc_w_pad"] = fc_w
    kp["fc_b_pad"] = fc_b
    return kp


if __name__ == "__main__":
    T, B = 8, 2
    VOCAB, E, H, L, OUT, INPUT_REP = 50, 32, 32, 2, 10, 1

    key = jax.random.PRNGKey(0)
    k_idx, k_case, k_par = jax.random.split(key, 3)

    emb_idx = jax.random.randint(k_idx, (T, B), 0, VOCAB, dtype=jnp.int32)
    case_features = jax.random.bernoulli(k_case, 0.3, (T, B, 3)).astype(jnp.float32)

    params = init_params(k_par, vocab=VOCAB, embedding_dim=E, input_rep=INPUT_REP,
                         num_layers=L, hidden_dim=H, output_dim=OUT)
    kparams = pack_params(params, num_layers=L, hidden_dim=H, output_dim=OUT,
                          embedding_dim=E, input_rep=INPUT_REP)

    roll_is_jnp = detect_roll_is_jnp()

    out = rnn_forward(emb_idx, case_features, params, kparams,
                      input_rep=INPUT_REP, num_layers=L, hidden_dim=H,
                      output_dim=OUT, roll_is_jnp=roll_is_jnp)
    out = jax.block_until_ready(out)

    ref = rnn_forward_ref(emb_idx, case_features, params,
                          input_rep=INPUT_REP, num_layers=L, hidden_dim=H)

    assert out.shape == (T, B, OUT), out.shape
    assert jnp.all(jnp.isfinite(out))
    assert jnp.allclose(out, ref, atol=1e-4, rtol=1e-4), float(jnp.abs(out - ref).max())
    print("KERNEL_OK")
</pallas_src>

<mosaic_0001>
module attributes {stable_mosaic.version = 11 : i64} {
  func.func @k(%arg0: memref<8x128xf32, #tpu.memory_space<vmem>>, %arg1: memref<8x128xf32, #tpu.memory_space<vmem>>) attributes {dimension_semantics = [], scalar_prefetch = 0 : i64, scratch_operands = 0 : i64, tpu.core_type = #tpu.core_type<tc>} {
    %c0 = arith.constant 0 : index
    %c0_0 = arith.constant 0 : index
    %0 = vector.load %arg0[%c0, %c0_0] : memref<8x128xf32, #tpu.memory_space<vmem>>, vector<8x128xf32>
    %c1_i32 = arith.constant 1 : i32
    %1 = tpu.dynamic_rotate %0 by %c1_i32 dim 1 : vector<8x128xf32>, i32 -> vector<8x128xf32>
    %c0_1 = arith.constant 0 : index
    %c0_2 = arith.constant 0 : index
    %2 = vector.load %arg1[%c0_1, %c0_2] : memref<8x128xf32, #tpu.memory_space<vmem>>, vector<8x128xf32>
    tpu.vector_store %arg1[%c0_1, %c0_2], %1 {strides = array<i32>} : memref<8x128xf32, #tpu.memory_space<vmem>>, vector<8x128xf32>,
    return
  }
}

</mosaic_0001>

<bundles_post_ra>
// kernel: tpu_custom_call.1
= control target key start
LH: loop header
LB: loop body
LE: loop exit
PB: predicated region body
PF: predicated region fallthrough
CT: control target
= control target key end

     0   :  { %6 = vsyncpa [#allocation3], 0  ;;  %s106_s0 = inlined_call_operand.hbm [shape: f32[8,128], index: 0, kind: input, shape index: {}]   ;;  %s107_s1 = inlined_call_operand.hbm [shape: f32[8,128], index: 1, kind: output, shape index: {}]  }
   0x1   :  { %7 = vsyncpa [#allocation4], 0  ;;  %s87_s6 = smov [#allocation2]  }
   0x2   :  { %s14_s7 = sshll.u32 %s87_s6, 4  ;;  %s15_s7 = int_to_ptr.vmem [resolvable:$true] %s14_s7 }
   0x3   :  { %s51_s8 = scalar_lea.vmem %s15_s7, 128  ;;  %p56_p1 = scmp.lt.s32.totalorder %s15_s7, %s15_s7 }
   0x4   :  { %p52_p0 = scmp.ne.s32.totalorder %s15_s7, %s51_s8  ;;  %p57_p2 = scmp.lt.s32.totalorder %s51_s8, %s51_s8 }
   0x6   :  { %p58_p3 = por %p57_p2, %p56_p1 }
   0x8   :  { %p59_p4 = pnand %p58_p3, %p52_p0 }
   0xa   :  { %62 = shalt.err (!%p59_p4)
}
   0xb   :  { %17 = dma.hbm_to_vmem [thread:$0]  %s106_s0, 128, %s15_s7, [#allocation3]  }
   0xc   :  { %83 = dma.done.wait [#allocation3], 128  }
   0xd   :  { %84 = vsyncadd [#allocation3], 4294967168  ;;  %v21_v0 = vld [vmem:[#allocation2] sm:$0xff]  ;;  %s88_s11 = smov 1   ;;  %s89_s12 = smov [#allocation5]  }
   0xe   :  { %22 = vrot.lane.b32.xlu0 %v21_v0, %s88_s11  ;;  %s31_s13 = sshll.u32 %s89_s12, 4  ;;  %s32_s13 = int_to_ptr.vmem [resolvable:$true] %s31_s13 }
   0xf   :  { %s63_s14 = scalar_lea.vmem %s32_s13, 128  ;;  %p68_p6 = scmp.lt.s32.totalorder %s32_s13, %s32_s13 }
  0x10   :  { %p64_p5 = scmp.ne.s32.totalorder %s32_s13, %s63_s14  ;;  %p69_p7 = scmp.lt.s32.totalorder %s63_s14, %s63_s14 }
  0x12   :  { %p70_p8 = por %p69_p7, %p68_p6 }
  0x14   :  { %p71_p9 = pnand %p70_p8, %p64_p5 }
  0x80   :  { %v23_v1 = vpop.permute.xlu0 %22 }
  0x81   :  { %24 = vst [vmem:[#allocation5] sm:$0xff] %v23_v1 }
  0x82   :  { %74 = shalt.err (!%p71_p9)
}
  0x83   :  { %34 = dma.vmem_to_hbm [thread:$0]  %s32_s13, 128, %s107_s1, [#allocation4]  }
  0x84   :  { %85 = dma.done.wait [#allocation4], 128  }
  0x85   :  { %86 = vsyncadd [#allocation4], 4294967168 }
  0x86   :  { %38 = vsyncpa [#allocation3], 1 }
  0x87   :  { %39 = vsyncpa [#allocation4], 1 }

</bundles_post_ra>
